<compile_context>
chip_gen: v5e
topology: v5e:2x2
jax: 0.10.0
libtpu: 0.0.40
codegen_flags: <defaults>
</compile_context>

<pallas_src>
import functools

import jax
import jax.numpy as jnp
from jax.experimental import pallas as pl
from jax.experimental.pallas import tpu as pltpu


def _round_up(x, m):
    return ((x + m - 1) // m) * m


def _default_vmem_limit_bytes():
    """Scoped-VMEM limit from physical capacity (v5e/v6e: 128 MiB, v7x: 64 MiB)."""
    cap = 64 * 1024 * 1024
    try:
        cap = int(pltpu.get_tpu_info().vmem_capacity_bytes)
    except Exception:
        pass
    if cap >= 100 * 1024 * 1024:
        return 100 * 1024 * 1024      # v5e / v6e: use most of the 128 MiB
    return 48 * 1024 * 1024           # v7x: leave headroom under 64 MiB


def _linear_layer_kernel(x_ref, gamma_ref, beta_ref, w_ref, b_ref, o_ref, xn_ref, *,
                         eps, d_real, use_ln, use_relu):
    """One (tm, tn) output tile.

    Grid = (row_tiles, col_tiles) with the column axis innermost. LayerNorm and
    the MXU-dtype cast run once per row tile (j == 0) into the persistent VMEM
    scratch `xn_ref`, then every column tile reuses it for the MXU matmul.
    """
    @pl.when(pl.program_id(1) == 0)
    def _():
        x = x_ref[...].astype(jnp.float32)
        d_pad = x.shape[-1]
        if use_ln:
            inv_d = jnp.float32(1.0 / d_real)
            if d_pad != d_real:
                # Padded lanes hold zeros; mask them out of the statistics so
                # LayerNorm matches the unpadded reference exactly.
                col = jax.lax.broadcasted_iota(jnp.int32, (1, d_pad), 1)
                mask = (col < d_real).astype(jnp.float32)
                xm = x * mask
            else:
                mask = None
                xm = x
            mean = jnp.sum(xm, axis=-1, keepdims=True) * inv_d
            centered = x - mean
            if mask is not None:
                centered = centered * mask
            var = jnp.sum(centered * centered, axis=-1, keepdims=True) * inv_d
            gamma = gamma_ref[...].astype(jnp.float32)
            beta = beta_ref[...].astype(jnp.float32)
            # gamma/beta are zero-padded, so padded lanes stay exactly 0.
            x = centered * jax.lax.rsqrt(var + eps) * gamma + beta
        # TODO(synk): nn.Dropout is identity in eval mode; training-mode random
        # masking (pltpu.prng_random_bits) is intentionally not implemented.
        xn_ref[...] = x.astype(xn_ref.dtype)

    y = jnp.dot(xn_ref[...], w_ref[...], preferred_element_type=jnp.float32)
    y = y + b_ref[...].astype(jnp.float32)
    if use_relu:
        y = jnp.maximum(y, 0.0)
    o_ref[...] = y.astype(o_ref.dtype)


def prepare_linear_params(gamma, beta, w, b, *, mxu_dtype=jnp.bfloat16):
    """Pad (lane-dense, multiples of 128) and cast parameters ONCE, outside the
    per-step path. Zero padding is inert: padded lanes / columns never leak."""
    D, out_hsz = w.shape
    D_pad = _round_up(D, 128)
    O_pad = _round_up(out_hsz, 128)
    gamma2 = jnp.pad(gamma.reshape(1, D).astype(jnp.float32),
                     ((0, 0), (0, D_pad - D)))
    beta2 = jnp.pad(beta.reshape(1, D).astype(jnp.float32),
                    ((0, 0), (0, D_pad - D)))
    w2 = jnp.pad(w.astype(mxu_dtype), ((0, D_pad - D), (0, O_pad - out_hsz)))
    b2 = jnp.pad(b.reshape(1, out_hsz).astype(jnp.float32),
                 ((0, 0), (0, O_pad - out_hsz)))
    return dict(gamma=gamma2, beta=beta2, w=w2, b=b2,
                d_real=D, out_hsz=out_hsz, mxu_dtype=mxu_dtype)


def linear_layer_apply(x, params, *, eps=1e-5, layer_norm=True, relu=True,
                       out_dtype=jnp.float32, tm=512, vmem_limit_bytes=None):
    """x: (N, L, D) -> (N, L, out_hsz). LayerNorm stats and accumulation in f32."""
    N, L, D = x.shape
    assert D == params["d_real"], "input feature dim does not match prepared weights"
    M = N * L

    gamma2, beta2, w2, b2 = params["gamma"], params["beta"], params["w"], params["b"]
    D_pad, O_pad = w2.shape
    out_hsz = params["out_hsz"]
    mxu_dtype = params["mxu_dtype"]

    if vmem_limit_bytes is None:
        vmem_limit_bytes = _default_vmem_limit_bytes()

    x_item = jnp.dtype(x.dtype).itemsize
    w_item = jnp.dtype(mxu_dtype).itemsize
    o_item = jnp.dtype(out_dtype).itemsize

    # ---- tile selection --------------------------------------------------
    # Row tile: multiple of 16 (clean bf16 sublane packing), clamped to M.
    tm = max(16, min(_round_up(tm, 16), _round_up(M, 16)))

    # Column-tile candidates: full residency first (weight DMA'd once for the
    # whole kernel), then 256-aligned tiles (full 256-wide MXU on v6e/v7x).
    tn_candidates = sorted(
        {c for c in (O_pad, 2048, 1024, 768, 512, 384, 256, 128)
         if c <= O_pad and O_pad % c == 0},
        reverse=True)

    def vmem_bytes(tm_, tn_):
        return (2 * tm_ * D_pad * x_item        # double-buffered x tile
                + tm_ * D_pad * w_item          # LN/cast scratch (persistent)
                + 3 * tm_ * D_pad * 4           # in-kernel f32 LN temporaries
                + 2 * D_pad * tn_ * w_item      # weight tile (double-buffered)
                + 2 * tm_ * tn_ * o_item        # output tile (double-buffered)
                + tm_ * tn_ * 4                 # f32 matmul result before cast
                + 2 * (2 * D_pad + tn_) * 4)    # gamma / beta / bias

    budget = int(vmem_limit_bytes * 0.75)
    ci = 0
    tn = tn_candidates[ci]
    # Co-shrink: reduce tn first (down to 256), then tm (down to 256), then the
    # rest -- the MXU never sees sliver LHS tiles unless absolutely forced.
    while vmem_bytes(tm, tn) > budget:
        if ci + 1 < len(tn_candidates) and tn > 256:
            ci += 1
            tn = tn_candidates[ci]
        elif tm > 256:
            tm = max(256, (tm // 2 // 16) * 16)
        elif ci + 1 < len(tn_candidates):
            ci += 1
            tn = tn_candidates[ci]
        elif tm > 16:
            tm = max(16, (tm // 2 // 16) * 16)
        else:
            break

    grid = (pl.cdiv(M, tm), O_pad // tn)

    # Flatten; pad only the feature axis, and only when it isn't lane-dense.
    # The row axis uses a partial last block (no full-tensor pad over M).
    x2 = x.reshape(M, D)
    if D_pad != D:
        x2 = jnp.pad(x2, ((0, 0), (0, D_pad - D)))

    kernel = functools.partial(_linear_layer_kernel, eps=eps, d_real=D,
                               use_ln=layer_norm, use_relu=relu)

    out2 = pl.pallas_call(
        kernel,
        out_shape=jax.ShapeDtypeStruct((M, O_pad), out_dtype),
        grid_spec=pltpu.PrefetchScalarGridSpec(
            num_scalar_prefetch=0,
            grid=grid,
            in_specs=[
                pl.BlockSpec((tm, D_pad), lambda i, j: (i, 0)),   # x rows
                pl.BlockSpec((1, D_pad), lambda i, j: (0, 0)),    # LN gamma
                pl.BlockSpec((1, D_pad), lambda i, j: (0, 0)),    # LN beta
                pl.BlockSpec((D_pad, tn), lambda i, j: (0, j)),   # weight (resident when tn == O_pad)
                pl.BlockSpec((1, tn), lambda i, j: (0, j)),       # bias
            ],
            out_specs=pl.BlockSpec((tm, tn), lambda i, j: (i, j)),
            scratch_shapes=[pltpu.VMEM((tm, D_pad), mxu_dtype)],  # LN/cast result
        ),
        compiler_params=pltpu.CompilerParams(
            dimension_semantics=("parallel", "arbitrary"),
            vmem_limit_bytes=vmem_limit_bytes),
    )(x2, gamma2, beta2, w2, b2)

    if O_pad != out_hsz:
        out2 = out2[:, :out_hsz]
    return out2.reshape(N, L, out_hsz)


def linear_layer(x, gamma, beta, w, b, *, mxu_dtype=jnp.bfloat16, **kwargs):
    """Convenience: prepare (pad/cast) params and apply in one call."""
    params = prepare_linear_params(gamma, beta, w, b, mxu_dtype=mxu_dtype)
    return linear_layer_apply(x, params, **kwargs)


def _reference(x, gamma, beta, w, b, *, eps=1e-5, layer_norm=True, relu=True):
    x = x.astype(jnp.float32)
    if layer_norm:
        mean = jnp.mean(x, axis=-1, keepdims=True)
        var = jnp.mean((x - mean) ** 2, axis=-1, keepdims=True)
        x = (x - mean) / jnp.sqrt(var + eps)
        x = x * gamma + beta
    y = x @ w + b
    if relu:
        y = jnp.maximum(y, 0.0)
    return y


if __name__ == "__main__":
    # Small shapes consistent with the module's (N, L, D) forward contract.
    N, L, in_hsz, out_hsz = 2, 8, 32, 32

    key = jax.random.PRNGKey(0)
    kx, kg, kb, kw, kbias = jax.random.split(key, 5)

    x = jax.random.normal(kx, (N, L, in_hsz), dtype=jnp.float32)

    # Deterministic parameter init (synthetic; mimics nn.LayerNorm / nn.Linear init).
    gamma = jnp.ones((in_hsz,), jnp.float32) + 0.01 * jax.random.normal(kg, (in_hsz,))
    beta = 0.01 * jax.random.normal(kb, (in_hsz,))
    bound = 1.0 / (in_hsz ** 0.5)
    w = jax.random.uniform(kw, (in_hsz, out_hsz), jnp.float32, -bound, bound)
    b = jax.random.uniform(kbias, (out_hsz,), jnp.float32, -bound, bound)

    ref = _reference(x, gamma, beta, w, b, layer_norm=True, relu=True)

    # Default path: bf16 MXU operands, f32 LayerNorm stats + f32 accumulation.
    params_bf16 = prepare_linear_params(gamma, beta, w, b, mxu_dtype=jnp.bfloat16)
    out_bf16 = jax.block_until_ready(
        linear_layer_apply(x, params_bf16, layer_norm=True, relu=True))
    assert out_bf16.shape == (N, L, out_hsz)
    assert jnp.allclose(out_bf16, ref, atol=5e-2, rtol=5e-2), "bf16 mismatch vs reference"

    # f32 MXU path: bit-comparable to the f32 reference.
    params_f32 = prepare_linear_params(gamma, beta, w, b, mxu_dtype=jnp.float32)
    out_f32 = jax.block_until_ready(
        linear_layer_apply(x, params_f32, layer_norm=True, relu=True))
    assert out_f32.shape == (N, L, out_hsz)
    assert jnp.allclose(out_f32, ref, atol=1e-5, rtol=1e-5), "f32 mismatch vs reference"

    # Module-config coverage: no LayerNorm, no ReLU.
    ref_plain = _reference(x, gamma, beta, w, b, layer_norm=False, relu=False)
    out_plain = jax.block_until_ready(
        linear_layer(x, gamma, beta, w, b, mxu_dtype=jnp.float32,
                     layer_norm=False, relu=False))
    assert jnp.allclose(out_plain, ref_plain, atol=1e-5, rtol=1e-5), "plain mismatch"

    print("KERNEL_OK")
</pallas_src>

<mosaic_0001>
module attributes {stable_mosaic.version = 11 : i64} {
  func.func @_linear_layer_kernel(%arg0: i32, %arg1: i32, %arg2: memref<16x128xf32, #tpu.memory_space<vmem>>, %arg3: memref<1x128xf32, #tpu.memory_space<vmem>>, %arg4: memref<1x128xf32, #tpu.memory_space<vmem>>, %arg5: memref<128x128xbf16, #tpu.memory_space<vmem>>, %arg6: memref<1x128xf32, #tpu.memory_space<vmem>>, %arg7: memref<16x128xf32, #tpu.memory_space<vmem>>, %arg8: memref<16x128xbf16, #tpu.memory_space<vmem>>) attributes {dimension_semantics = [#tpu.dimension_semantics<parallel>, #tpu.dimension_semantics<arbitrary>], iteration_bounds = array<i64: 1, 1>, scalar_prefetch = 0 : i64, scratch_operands = 1 : i64, tpu.core_type = #tpu.core_type<tc>, window_params = [{transform_indices = @transform_0, window_bounds = array<i64: 16, 128>}, {pipeline_mode = #tpu.pipeline_mode<synchronous>, transform_indices = @transform_1, window_bounds = array<i64: 1, 128>}, {pipeline_mode = #tpu.pipeline_mode<synchronous>, transform_indices = @transform_2, window_bounds = array<i64: 1, 128>}, {transform_indices = @transform_3, window_bounds = array<i64: 128, 128>}, {transform_indices = @transform_4, window_bounds = array<i64: 1, 128>}, {transform_indices = @transform_5, window_bounds = array<i64: 16, 128>}]} {
    %c0_i32 = arith.constant 0 : i32
    %0 = arith.cmpi eq, %arg1, %c0_i32 : i32
    %1 = arith.extui %0 : i1 to i32
    %c0_i32_0 = arith.constant 0 : i32
    %2 = arith.cmpi ne, %1, %c0_i32_0 : i32
    scf.if %2 {
      %c0_9 = arith.constant 0 : index
      %c0_10 = arith.constant 0 : index
      %12 = vector.load %arg2[%c0_9, %c0_10] : memref<16x128xf32, #tpu.memory_space<vmem>>, vector<16x128xf32>
      %13 = tpu.iota {dimensions = array<i32: 1>} : vector<1x128xi32>
      %c32_i32 = arith.constant 32 : i32
      %14 = vector.broadcast %c32_i32 : i32 to vector<1x128xi32>
      %15 = arith.cmpi slt, %13, %14 : vector<1x128xi32>
      %16 = arith.extui %15 : vector<1x128xi1> to vector<1x128xi32>
      %17 = arith.sitofp %16 : vector<1x128xi32> to vector<1x128xf32>
      %18 = vector.broadcast %17 : vector<1x128xf32> to vector<16x128xf32>
      %19 = arith.mulf %12, %18 : vector<16x128xf32>
      %cst_11 = arith.constant dense<0.000000e+00> : vector<16xf32>
      %20 = vector.multi_reduction <add>, %19, %cst_11 [1] : vector<16x128xf32> to vector<16xf32>
      %21 = vector.shape_cast %20 : vector<16xf32> to vector<16x1xf32>
      %cst_12 = arith.constant 3.125000e-02 : f32
      %22 = vector.broadcast %cst_12 : f32 to vector<16x1xf32>
      %23 = arith.mulf %21, %22 : vector<16x1xf32>
      %24 = vector.broadcast %23 : vector<16x1xf32> to vector<16x128xf32>
      %25 = arith.subf %12, %24 : vector<16x128xf32>
      %26 = vector.broadcast %17 : vector<1x128xf32> to vector<16x128xf32>
      %27 = arith.mulf %25, %26 : vector<16x128xf32>
      %28 = arith.mulf %27, %27 : vector<16x128xf32>
      %cst_13 = arith.constant dense<0.000000e+00> : vector<16xf32>
      %29 = vector.multi_reduction <add>, %28, %cst_13 [1] : vector<16x128xf32> to vector<16xf32>
      %30 = vector.shape_cast %29 : vector<16xf32> to vector<16x1xf32>
      %cst_14 = arith.constant 3.125000e-02 : f32
      %31 = vector.broadcast %cst_14 : f32 to vector<16x1xf32>
      %32 = arith.mulf %30, %31 : vector<16x1xf32>
      %c0_15 = arith.constant 0 : index
      %c0_16 = arith.constant 0 : index
      %33 = vector.load %arg3[%c0_15, %c0_16] : memref<1x128xf32, #tpu.memory_space<vmem>>, vector<1x128xf32>
      %c0_17 = arith.constant 0 : index
      %c0_18 = arith.constant 0 : index
      %34 = vector.load %arg4[%c0_17, %c0_18] : memref<1x128xf32, #tpu.memory_space<vmem>>, vector<1x128xf32>
      %cst_19 = arith.constant 9.99999974E-6 : f32
      %35 = vector.broadcast %cst_19 : f32 to vector<16x1xf32>
      %36 = arith.addf %32, %35 : vector<16x1xf32>
      %37 = math.rsqrt %36 : vector<16x1xf32>
      %38 = vector.broadcast %37 : vector<16x1xf32> to vector<16x128xf32>
      %39 = arith.mulf %27, %38 : vector<16x128xf32>
      %40 = vector.broadcast %33 : vector<1x128xf32> to vector<16x128xf32>
      %41 = arith.mulf %39, %40 : vector<16x128xf32>
      %42 = vector.broadcast %34 : vector<1x128xf32> to vector<16x128xf32>
      %43 = arith.addf %41, %42 : vector<16x128xf32>
      %44 = arith.truncf %43 : vector<16x128xf32> to vector<16x128xbf16>
      %c0_20 = arith.constant 0 : index
      %c0_21 = arith.constant 0 : index
      %45 = vector.load %arg8[%c0_20, %c0_21] : memref<16x128xbf16, #tpu.memory_space<vmem>>, vector<16x128xbf16>
      tpu.vector_store %arg8[%c0_20, %c0_21], %44 {strides = array<i32>} : memref<16x128xbf16, #tpu.memory_space<vmem>>, vector<16x128xbf16>,
    } else {
    }
    %c0 = arith.constant 0 : index
    %c0_1 = arith.constant 0 : index
    %3 = vector.load %arg8[%c0, %c0_1] : memref<16x128xbf16, #tpu.memory_space<vmem>>, vector<16x128xbf16>
    %c0_2 = arith.constant 0 : index
    %c0_3 = arith.constant 0 : index
    %4 = vector.load %arg5[%c0_2, %c0_3] : memref<128x128xbf16, #tpu.memory_space<vmem>>, vector<128x128xbf16>
    %cst = arith.constant dense<0.000000e+00> : vector<16x128xf32>
    %5 = tpu.matmul %3, %4, %cst {dimension_numbers = #tpu.dot_dimension_numbers<[1], [0], [0], [1], [0, 0, 1, 1], [], []>} : vector<16x128xbf16>, vector<128x128xbf16>, vector<16x128xf32> -> vector<16x128xf32>
    %c0_4 = arith.constant 0 : index
    %c0_5 = arith.constant 0 : index
    %6 = vector.load %arg6[%c0_4, %c0_5] : memref<1x128xf32, #tpu.memory_space<vmem>>, vector<1x128xf32>
    %7 = vector.broadcast %6 : vector<1x128xf32> to vector<16x128xf32>
    %8 = arith.addf %5, %7 : vector<16x128xf32>
    %cst_6 = arith.constant 0.000000e+00 : f32
    %9 = vector.broadcast %cst_6 : f32 to vector<16x128xf32>
    %10 = arith.maximumf %8, %9 : vector<16x128xf32>
    %c0_7 = arith.constant 0 : index
    %c0_8 = arith.constant 0 : index
    %11 = vector.load %arg7[%c0_7, %c0_8] : memref<16x128xf32, #tpu.memory_space<vmem>>, vector<16x128xf32>
    tpu.vector_store %arg7[%c0_7, %c0_8], %10 {strides = array<i32>} : memref<16x128xf32, #tpu.memory_space<vmem>>, vector<16x128xf32>,
    return
  }
  func.func @transform_0(%arg0: i32, %arg1: i32) -> (i32, i32) {
    %c0_i32 = arith.constant 0 : i32
    %c0_i32_0 = arith.constant 0 : i32
    return %arg0, %c0_i32 : i32, i32
  }
  func.func @transform_1(%arg0: i32, %arg1: i32) -> (i32, i32) {
    %c0_i32 = arith.constant 0 : i32
    %c0_i32_0 = arith.constant 0 : i32
    %c0_i32_1 = arith.constant 0 : i32
    return %c0_i32, %c0_i32_0 : i32, i32
  }
  func.func @transform_2(%arg0: i32, %arg1: i32) -> (i32, i32) {
    %c0_i32 = arith.constant 0 : i32
    %c0_i32_0 = arith.constant 0 : i32
    %c0_i32_1 = arith.constant 0 : i32
    return %c0_i32, %c0_i32_0 : i32, i32
  }
  func.func @transform_3(%arg0: i32, %arg1: i32) -> (i32, i32) {
    %c0_i32 = arith.constant 0 : i32
    %c0_i32_0 = arith.constant 0 : i32
    return %c0_i32, %arg1 : i32, i32
  }
  func.func @transform_4(%arg0: i32, %arg1: i32) -> (i32, i32) {
    %c0_i32 = arith.constant 0 : i32
    %c0_i32_0 = arith.constant 0 : i32
    return %c0_i32, %arg1 : i32, i32
  }
  func.func @transform_5(%arg0: i32, %arg1: i32) -> (i32, i32) {
    %c0_i32 = arith.constant 0 : i32
    return %arg0, %arg1 : i32, i32
  }
}

</mosaic_0001>

<bundles_post_ra>
// kernel: tpu_custom_call.1
= control target key start
LH: loop header
LB: loop body
LE: loop exit
PB: predicated region body
PF: predicated region fallthrough
CT: control target
= control target key end

     0   :  { %10 = vsyncpa [#allocation4], 0  ;;  %s483_s0 = inlined_call_operand.hbm [shape: f32[16,128], index: 0, kind: input, shape index: {}]   ;;  %s484_s1 = inlined_call_operand.hbm [shape: f32[1,128], index: 1, kind: input, shape index: {}]   ;;  %s485_s2 = inlined_call_operand.vmem [shape: f32[1,128], index: 2, kind: input, shape index: {}]   ;;  %s486_s3 = inlined_call_operand.hbm [shape: bf16[128,128], index: 3, kind: input, shape index: {}]   ;;  %s487_s4 = inlined_call_operand.vmem [shape: f32[1,128], index: 4, kind: input, shape index: {}]   ;;  %s488_s5 = inlined_call_operand.hbm [shape: f32[16,128], index: 5, kind: output, shape index: {}]  }
   0x1   :  { %11 = vsyncpa [#allocation7], 0  ;;  %s31_s20 = sshll.u32 %s484_s1, 4  ;;  %s32_s20 = int_to_ptr.hbm [resolvable:$true] %s31_s20 }
   0x2   :  { %12 = vsyncpa [#allocation5], 0  ;;  %s420_s21 = smov [#allocation6]   ;;  %s17_s25 = sshll.u32 %s483_s0, 4  ;;  %s18_s25 = int_to_ptr.hbm [resolvable:$true] %s17_s25 }
   0x3   :  { %s33_s22 = sshll.u32 %s420_s21, 4  ;;  %s421_s26 = smov [#allocation3]   ;;  %s34_s22 = int_to_ptr.vmem [resolvable:$true] %s33_s22 }
   0x4   :  { %36 = dma.hbm_to_vmem [thread:$0]  %s32_s20, 16, %s34_s22, [#allocation7]  }
   0x5   :  { %s19_s27 = sshll.u32 %s421_s26, 4  ;;  %s422_s28 = smov 128   ;;  %s20_s27 = int_to_ptr.vmem [resolvable:$true] %s19_s27 }
   0x6   :  { %s423_s29 = smov 8   ;;  %s43_s6 = sshll.u32 %s486_s3, 4  ;;  %s44_s6 = int_to_ptr.hbm [resolvable:$true] %s43_s6 }
   0x7   :  { %25 = dma.hbm_to_vmem [thread:$0]  %s18_s25, 256, %s20_s27, [#allocation4], %s422_s28, %s422_s28, %s423_s29  }
   0x8   :  { %s424_s7 = smov [#allocation8]   ;;  %s425_s0 = smov 64  }
   0x9   :  { %s45_s8 = sshll.u32 %s424_s7, 4  ;;  %s426_s9 = smov 4   ;;  %s46_s8 = int_to_ptr.vmem [resolvable:$true] %s45_s8 }
   0xa   :  { %51 = dma.hbm_to_vmem [thread:$0]  %s44_s6, 1024, %s46_s8, [#allocation7], %s425_s0, %s425_s0, %s426_s9  }
   0xb   :  { %414 = dma.done.wait [#allocation4], 256  }
   0xc   :  { %415 = vsyncadd [#allocation4], 4294967040 }
   0xd   :  { %416 = dma.done.wait [#allocation7], 1040  }
   0xe   :  { %417 = vsyncadd [#allocation7], 4294966256  ;;  %v72_v0 = vlaneseq  ;;  %v427_v2 = vmov 0.0   ;;  %v70_v4 = vld [vmem:[#allocation3] sm:$0xff]  ;;  %v71_v6 = vld [vmem:[#allocation3 + $0x8] sm:$0xff]  ;;  %s428_s13 = smov [#allocation9]  }
   0xf   :  { %v296_v18 = vld [vmem:[#allocation8 + $0x38] sm:$0xff]  ;;  %v295_v19 = vld [vmem:[#allocation8 + $0x30] sm:$0xff]  ;;  %v294_v20 = vld [vmem:[#allocation8 + $0x28] sm:$0xff]  ;;  %s237_s16 = sshll.u32 %s488_s5, 4  ;;  %s238_s16 = int_to_ptr.hbm [resolvable:$true] %s237_s16 }
  0x10   :  { %v73_v1 = vand.u32 127, %v72_v0  ;;  %213 = vmatpush.bf16.msra.mxu0 %v296_v18  ;;  %v293_v21 = vld [vmem:[#allocation8 + $0x20] sm:$0xff]  ;;  %v292_v22 = vld [vmem:[#allocation8 + $0x18] sm:$0xff]  ;;  %v291_v26 = vld [vmem:[#allocation8 + $0x10] sm:$0xff] }
  0x11   :  { %v290_v27 = vld [vmem:[#allocation8 + $0x8] sm:$0xff]  ;;  %v289_v30 = vld [vmem:[#allocation8] sm:$0xff]  ;;  %v311_v44 = vld [vmem:[#allocation6] ss:$0 sm:$0xff] }
  0x12   :  { %vm74_vm0 = vcmp.lt.s32.totalorder %v73_v1, 32  ;;  %v312_v48 = vld [vmem:[%s485_s2] ss:$0 sm:$0xff]  ;;  %s235_s2 = sshll.u32 %s428_s13, 4  ;;  %s236_s2 = int_to_ptr.vmem [resolvable:$true] %s235_s2 }
  0x13   :  { %v251_v3 = vsel %vm74_vm0, 1.0, %v427_v2  ;;  %v313_v56 = vld [vmem:[%s487_s4] ss:$0 sm:$0xff] }
  0x14   :  { %v77_v5 = vmul.f32 %v251_v3, %v70_v4  ;;  %v78_v7 = vmul.f32 %v251_v3, %v71_v6  ;;  %214 = vmatpush.bf16.msra.mxu0 %v295_v19 }
  0x16   :  { %79 = vadd.xlane.f32.xlu0 %v77_v5 }
  0x18   :  { %215 = vmatpush.bf16.msra.mxu0 %v294_v20 }
  0x1c   :  { %216 = vmatpush.bf16.msra.mxu0 %v293_v21 }
  0x1e   :  { %81 = vadd.xlane.f32.xlu0 %v78_v7 }
  0x20   :  { %217 = vmatpush.bf16.msra.mxu0 %v292_v22 }
  0x24   :  { %218 = vmatpush.bf16.msra.mxu0 %v291_v26 }
  0x28   :  { %219 = vmatpush.bf16.msra.mxu0 %v290_v27 }
  0x2c   :  { %220 = vmatpush.bf16.msra.mxu0 %v289_v30 }
  0x89   :  { %v80_v8 = vpop.xlane.xlu0 %79 }
  0x8a   :  { %v83_v9 = vmul.f32 0.03125, %v80_v8 }
  0x8c   :  { %v85_v10 = vsub.f32 %v70_v4, %v83_v9 }
  0x8e   :  { %v87_v11 = vmul.f32 %v251_v3, %v85_v10 }
  0x90   :  { %v89_v12 = vmul.f32 %v87_v11, %v87_v11 }
  0x91   :  { %v82_v13 = vpop.xlane.xlu0 %81 }
  0x92   :  { %v84_v14 = vmul.f32 0.03125, %v82_v13  ;;  %91 = vadd.xlane.f32.xlu1 %v89_v12 }
  0x94   :  { %v86_v15 = vsub.f32 %v71_v6, %v84_v14 }
  0x96   :  { %v88_v16 = vmul.f32 %v251_v3, %v86_v15 }
  0x98   :  { %v90_v17 = vmul.f32 %v88_v16, %v88_v16 }
  0x9a   :  { %93 = vadd.xlane.f32.xlu1 %v90_v17 }
 0x105   :  { %v92_v23 = vpop.xlane.xlu1 %91 }
 0x106   :  { %v95_v24 = vmul.f32 0.03125, %v92_v23 }
 0x108   :  { %v99_v25 = vadd.f32 1e-05, %v95_v24 }
 0x10a   :  { %314 = vrsqrt.f32 %v99_v25  ;;  %vm107_vm2 = vweird.f32 %v99_v25 }
 0x10d   :  { %v94_v28 = vpop.xlane.xlu1 %93 }
 0x10e   :  { %v96_v29 = vmul.f32 0.03125, %v94_v28 }
 0x110   :  { %v315_v31 = vpop.eup %314  ;;  %v100_v32 = vadd.f32 1e-05, %v96_v29 }
 0x111   :  { %v102_v33 = vmul.f32 %v315_v31, %v99_v25  ;;  %vm108_vm1 = vweird.f32 %v315_v31 }
 0x112   :  { %316 = vrsqrt.f32 %v100_v32  ;;  %vm109_vm3 = vmor %vm107_vm2, %vm108_vm1  ;;  %vm117_vm5 = vweird.f32 %v100_v32 }
 0x113   :  { %v103_v34 = vmul.f32 %v315_v31, %v102_v33 }
 0x115   :  { %v104_v35 = vmul.f32 0.5, %v103_v34 }
 0x117   :  { %v105_v36 = vsub.f32 1.5, %v104_v35 }
 0x118   :  { %v317_v37 = vpop.eup %316 }
 0x119   :  { %v106_v38 = vmul.f32 %v315_v31, %v105_v36  ;;  %v112_v39 = vmul.f32 %v317_v37, %v100_v32  ;;  %vm118_vm4 = vweird.f32 %v317_v37 }
 0x11a   :  { %vm119_vm6 = vmor %vm117_vm5, %vm118_vm4 }
 0x11b   :  { %v113_v40 = vmul.f32 %v317_v37, %v112_v39  ;;  %v110_v41 = vsel %vm109_vm3, %v315_v31, %v106_v38 }
 0x11c   :  { %v121_v45 = vmul.f32 %v110_v41, %v87_v11 }
 0x11d   :  { %v114_v42 = vmul.f32 0.5, %v113_v40 }
 0x11e   :  { %v126_v49 = vmul.f32 %v311_v44, %v121_v45 }
 0x11f   :  { %v115_v43 = vsub.f32 1.5, %v114_v42 }
 0x120   :  { %v131_v52 = vadd.f32 %v312_v48, %v126_v49 }
 0x121   :  { %v116_v46 = vmul.f32 %v317_v37, %v115_v43 }
 0x123   :  { %v120_v47 = vsel %vm119_vm6, %v317_v37, %v116_v46 }
 0x124   :  { %v122_v50 = vmul.f32 %v120_v47, %v88_v16 }
 0x126   :  { %v127_v51 = vmul.f32 %v311_v44, %v122_v50 }
 0x128   :  { %v132_v53 = vadd.f32 %v312_v48, %v127_v51 }
 0x12a   :  { %v300_v54 = vpack.c.bf16 %v132_v53, %v131_v52 }
 0x12c   :  { %301 = vst [vmem:[#allocation2] sm:$0xff] %v300_v54  }
 0x133   :  { %v288_v55 = vld [vmem:[#allocation2] sm:$0xff] }
 0x134   :  { %221 = vmatmul.bf16.vlgmr.msra.gmra.mxu0 %v288_v55 }
 0x1b1   :  { %v222_v57 = vpop.f32.mrf.mxu0 }
 0x1b2   :  { %v223_v58 = vadd.f32 %v313_v56, %v222_v57 }
 0x1b4   :  { %v227_v59 = vmax.f32 %v223_v58, 0.0 }
 0x1b6   :  { %229 = vst [vmem:[#allocation9] sm:$0xff] %v227_v59 }
 0x1b9   :  { %v224_v60 = vpop.f32.mrf.mxu0 }
 0x1ba   :  { %v225_v61 = vadd.f32 %v313_v56, %v224_v60 }
 0x1bc   :  { %v228_v62 = vmax.f32 %v225_v61, 0.0 }
 0x1be   :  { %230 = vst [vmem:[#allocation9 + $0x8] sm:$0xff] %v228_v62 }
 0x1bf   :  { %243 = dma.vmem_to_hbm [thread:$0]  %s236_s2, 256, %s238_s16, [#allocation5], %s422_s28, %s422_s28, %s423_s29  }
 0x1c0   :  { %418 = dma.done.wait [#allocation5], 256  }
 0x1c1   :  { %419 = vsyncadd [#allocation5], 4294967040 }
 0x1c2   :  { %248 = vsyncpa [#allocation4], 1 }
 0x1c3   :  { %249 = vsyncpa [#allocation7], 1 }
 0x1c4   :  { %250 = vsyncpa [#allocation5], 1 }

</bundles_post_ra>
